<compile_context>
chip_gen: v5e
topology: v5e:2x2
jax: 0.10.0
libtpu: 0.0.40
codegen_flags: <defaults>
</compile_context>

<pallas_src>
import functools
import math

import jax
import jax.numpy as jnp
from jax.experimental import pallas as pl
from jax.experimental.pallas import tpu as pltpu


def _eca_kernel(x_ref, w_ref, o_ref, *, inv_hw):
    # x_ref / o_ref: (R_TILE, HW) block; w_ref: (R_TILE, 1) f32 center taps.
    x = x_ref[...]
    # Global average pool over spatial (lane reduction).  Accumulate in f32
    # without materializing an f32 copy of the whole block; divide by the
    # true H*W.
    pooled = jnp.sum(x, axis=-1, keepdims=True, dtype=jnp.float32) * inv_hw
    z = pooled * w_ref[...]                       # (R_TILE, 1) f32
    gate = 1.0 / (1.0 + jnp.exp(-z))              # sigmoid on R_TILE scalars (EUP)
    # Broadcast multiply in the native dtype (bf16 VPU on v6e/v7x); store is
    # unmasked wherever HW is a multiple of 128, masked only on the tail.
    o_ref[...] = x * gate.astype(o_ref.dtype)


def _pick_row_tile(n_rows, row_bytes, budget_bytes):
    """Pick the largest row tile that (a) divides n_rows, (b) is a multiple of
    8 sublanes (or the full n_rows), (c) keeps one block under budget_bytes.
    Returns (tile, padded_rows); padded_rows > n_rows only on the rare
    fallback path where no valid divisor exists."""
    if n_rows * row_bytes <= budget_bytes:
        return n_rows, n_rows
    max_rows = max(int(budget_bytes // row_bytes), 8)
    max_rows = (max_rows // 8) * 8
    best = 0
    for t in range(8, min(n_rows, max_rows) + 1, 8):
        if n_rows % t == 0:
            best = t
    if best:
        return best, n_rows
    # Fallback: no multiple-of-8 divisor fits the budget; pad rows.  Zero rows
    # are inert (pooled=0 -> gate=0.5 -> out=0) and are sliced off after the
    # call.  This path costs one extra HBM copy, but only triggers for odd
    # B*C that also overflows the per-block budget.
    tile = max_rows
    padded = ((n_rows + tile - 1) // tile) * tile
    return tile, padded


def eca_block(x, conv_weight, *, row_block_budget_bytes=8 << 20):
    """x: (B, C, H, W); conv_weight: (C, 1, K) depthwise Conv1d weight."""
    B, C, H, W = x.shape
    K = conv_weight.shape[-1]
    center = (K - 1) // 2
    # Only the center tap matters on a zero-padded length-1 sequence (exact).
    w_center = conv_weight[:, 0, center].astype(jnp.float32)        # (C,)

    HW = H * W
    BC = B * C
    x2 = x.reshape(BC, HW)                                           # free (contiguous)
    w2 = jnp.tile(w_center, (B,)).reshape(BC, 1)                     # tiny (B*C floats)

    itemsize = jnp.dtype(x.dtype).itemsize
    row_bytes = HW * itemsize
    r_tile, rows = _pick_row_tile(BC, row_bytes, row_block_budget_bytes)
    if rows != BC:
        x2 = jnp.pad(x2, ((0, rows - BC), (0, 0)))
        w2 = jnp.pad(w2, ((0, rows - BC), (0, 0)))

    block_bytes = r_tile * row_bytes
    # 2x double-buffered input blocks + 2x output blocks + slack; raise the
    # default scoped limit but stay under v7x's 64 MiB physical VMEM.
    vmem_limit = int(min(max(4 * block_bytes + (8 << 20), 32 << 20), 56 << 20))

    kernel = functools.partial(_eca_kernel, inv_hw=1.0 / float(HW))

    out = pl.pallas_call(
        kernel,
        out_shape=jax.ShapeDtypeStruct((rows, HW), x.dtype),
        grid_spec=pltpu.PrefetchScalarGridSpec(
            num_scalar_prefetch=0,
            grid=(rows // r_tile,),
            in_specs=[
                pl.BlockSpec((r_tile, HW), lambda i: (i, 0)),
                pl.BlockSpec((r_tile, 1), lambda i: (i, 0)),
            ],
            out_specs=pl.BlockSpec((r_tile, HW), lambda i: (i, 0)),
        ),
        compiler_params=pltpu.CompilerParams(
            dimension_semantics=("parallel",),
            vmem_limit_bytes=vmem_limit,
        ),
        cost_estimate=pl.CostEstimate(
            flops=3 * BC * HW,            # lane reduce + broadcast multiply
            transcendentals=BC,           # exp in sigmoid
            bytes_accessed=2 * BC * HW * itemsize),
    )(x2, w2)

    if rows != BC:
        out = out[:BC]
    return out.reshape(B, C, H, W)


def make_eca_params(channels, gamma=2, b=1, seed=0):
    """Deterministic init matching ECABlock.__init__ (kaiming_uniform, fan_in, relu)."""
    kernel_size = int(abs((math.log2(channels) + b) / gamma))
    kernel_size = kernel_size if kernel_size % 2 else kernel_size + 1
    fan_in = 1 * kernel_size  # in_channels/groups * k
    gain = math.sqrt(2.0)     # relu
    bound = gain * math.sqrt(3.0 / fan_in)
    key = jax.random.PRNGKey(seed)
    weight = jax.random.uniform(
        key, (channels, 1, kernel_size), dtype=jnp.float32,
        minval=-bound, maxval=bound)
    return weight


def _reference(x, conv_weight):
    # Pure-JAX reference of the PyTorch forward (given module semantics).
    C = x.shape[1]
    K = conv_weight.shape[-1]
    pooled = jnp.mean(x.astype(jnp.float32), axis=(2, 3), keepdims=True)  # (B,C,1,1)
    wc = conv_weight[:, 0, (K - 1) // 2].reshape(1, C, 1, 1)
    y = jax.nn.sigmoid(pooled * wc)
    return (x.astype(jnp.float32) * y).astype(x.dtype)


if __name__ == "__main__":
    key = jax.random.PRNGKey(0)
    k1, k2, k3, k4 = jax.random.split(key, 4)

    # Primary small shape (HW a multiple of 128; single full-slab tile, BC=8).
    B, C, H, W = 2, 4, 16, 16
    x = jax.random.normal(k1, (B, C, H, W), dtype=jnp.float32)
    conv_weight = make_eca_params(C)
    out = jax.block_until_ready(eca_block(x, conv_weight))
    ref = _reference(x, conv_weight)
    assert out.shape == (B, C, H, W)
    assert jnp.allclose(out, ref, atol=1e-5, rtol=1e-5)

    # Non-128-multiple spatial (7x7 -> masked tail store, no wrapper pad) and
    # row tiling (tiny budget forces r_tile=16 < BC=32, grid=(2,)).
    B2, C2, H2, W2 = 2, 16, 7, 7
    x2 = jax.random.normal(k2, (B2, C2, H2, W2), dtype=jnp.float32)
    conv_weight2 = make_eca_params(C2)
    out2 = jax.block_until_ready(
        eca_block(x2, conv_weight2, row_block_budget_bytes=4096))
    ref2 = _reference(x2, conv_weight2)
    assert out2.shape == (B2, C2, H2, W2)
    assert jnp.allclose(out2, ref2, atol=1e-5, rtol=1e-5)

    # Fallback path: BC=12 has no multiple-of-8 divisor under a tiny budget ->
    # rows padded to 16 and sliced back.
    B3, C3, H3, W3 = 3, 4, 7, 7
    x3 = jax.random.normal(k3, (B3, C3, H3, W3), dtype=jnp.float32)
    conv_weight3 = make_eca_params(C3)
    out3 = jax.block_until_ready(
        eca_block(x3, conv_weight3, row_block_budget_bytes=1024))
    ref3 = _reference(x3, conv_weight3)
    assert out3.shape == (B3, C3, H3, W3)
    assert jnp.allclose(out3, ref3, atol=1e-5, rtol=1e-5)

    # bf16 path (native VPU multiply, f32 pooling accumulation).
    x4 = jax.random.normal(k4, (B, C, H, W), dtype=jnp.bfloat16)
    out4 = jax.block_until_ready(eca_block(x4, conv_weight))
    ref4 = _reference(x4, conv_weight)
    assert out4.shape == (B, C, H, W)
    assert jnp.allclose(out4.astype(jnp.float32), ref4.astype(jnp.float32),
                        atol=5e-2, rtol=5e-2)

    print("KERNEL_OK")
</pallas_src>

<mosaic_0001>
module attributes {stable_mosaic.version = 11 : i64} {
  func.func @_eca_kernel(%arg0: i32, %arg1: memref<8x256xf32, #tpu.memory_space<vmem>>, %arg2: memref<8x1xf32, #tpu.memory_space<vmem>>, %arg3: memref<8x256xf32, #tpu.memory_space<vmem>>) attributes {dimension_semantics = [#tpu.dimension_semantics<parallel>], iteration_bounds = array<i64: 1>, scalar_prefetch = 0 : i64, scratch_operands = 0 : i64, tpu.core_type = #tpu.core_type<tc>, window_params = [{transform_indices = @transform_0, window_bounds = array<i64: 8, 256>}, {transform_indices = @transform_1, window_bounds = array<i64: 8, 1>}, {transform_indices = @transform_2, window_bounds = array<i64: 8, 256>}]} {
    %c0 = arith.constant 0 : index
    %c0_0 = arith.constant 0 : index
    %0 = vector.load %arg1[%c0, %c0_0] : memref<8x256xf32, #tpu.memory_space<vmem>>, vector<8x256xf32>
    %cst = arith.constant dense<0.000000e+00> : vector<8xf32>
    %1 = vector.multi_reduction <add>, %0, %cst [1] : vector<8x256xf32> to vector<8xf32>
    %2 = vector.shape_cast %1 : vector<8xf32> to vector<8x1xf32>
    %cst_1 = arith.constant 3.906250e-03 : f32
    %3 = vector.broadcast %cst_1 : f32 to vector<8x1xf32>
    %4 = arith.mulf %2, %3 : vector<8x1xf32>
    %c0_2 = arith.constant 0 : index
    %c0_3 = arith.constant 0 : index
    %5 = vector.load %arg2[%c0_2, %c0_3] : memref<8x1xf32, #tpu.memory_space<vmem>>, vector<8x1xf32>
    %6 = arith.mulf %4, %5 : vector<8x1xf32>
    %cst_4 = arith.constant 0.000000e+00 : f32
    %7 = vector.broadcast %cst_4 : f32 to vector<8x1xf32>
    %8 = arith.subf %7, %6 : vector<8x1xf32>
    %9 = math.exp %8 : vector<8x1xf32>
    %cst_5 = arith.constant 1.000000e+00 : f32
    %10 = vector.broadcast %cst_5 : f32 to vector<8x1xf32>
    %11 = arith.addf %10, %9 : vector<8x1xf32>
    %cst_6 = arith.constant 1.000000e+00 : f32
    %12 = vector.broadcast %cst_6 : f32 to vector<8x1xf32>
    %13 = arith.divf %12, %11 : vector<8x1xf32>
    %14 = vector.broadcast %13 : vector<8x1xf32> to vector<8x256xf32>
    %15 = arith.mulf %0, %14 : vector<8x256xf32>
    %c0_7 = arith.constant 0 : index
    %c0_8 = arith.constant 0 : index
    %16 = vector.load %arg3[%c0_7, %c0_8] : memref<8x256xf32, #tpu.memory_space<vmem>>, vector<8x256xf32>
    tpu.vector_store %arg3[%c0_7, %c0_8], %15 {strides = array<i32>} : memref<8x256xf32, #tpu.memory_space<vmem>>, vector<8x256xf32>,
    return
  }
  func.func @transform_0(%arg0: i32) -> (i32, i32) {
    %c0_i32 = arith.constant 0 : i32
    %c0_i32_0 = arith.constant 0 : i32
    return %arg0, %c0_i32 : i32, i32
  }
  func.func @transform_1(%arg0: i32) -> (i32, i32) {
    %c0_i32 = arith.constant 0 : i32
    %c0_i32_0 = arith.constant 0 : i32
    return %arg0, %c0_i32 : i32, i32
  }
  func.func @transform_2(%arg0: i32) -> (i32, i32) {
    %c0_i32 = arith.constant 0 : i32
    %c0_i32_0 = arith.constant 0 : i32
    return %arg0, %c0_i32 : i32, i32
  }
}

</mosaic_0001>

<bundles_post_ra>
// kernel: tpu_custom_call.1
= control target key start
LH: loop header
LB: loop body
LE: loop exit
PB: predicated region body
PF: predicated region fallthrough
CT: control target
= control target key end

     0   :  { %7 = vsyncpa [#allocation3], 0  ;;  %s166_s0 = inlined_call_operand.hbm [shape: f32[8,256], index: 0, kind: input, shape index: {}]   ;;  %s167_s1 = inlined_call_operand.vmem [shape: f32[8,1], index: 1, kind: input, shape index: {}]   ;;  %s168_s2 = inlined_call_operand.hbm [shape: f32[8,256], index: 2, kind: output, shape index: {}]  }
   0x1   :  { %8 = vsyncpa [#allocation4], 0  ;;  %s14_s11 = sshll.u32 %s166_s0, 4  ;;  %s139_s12 = smov [#allocation2]   ;;  %s15_s11 = int_to_ptr.hbm [resolvable:$true] %s14_s11 }
   0x2   :  { %s16_s13 = sshll.u32 %s139_s12, 4  ;;  %s17_s13 = int_to_ptr.vmem [resolvable:$true] %s16_s13 }
   0x3   :  { %19 = dma.hbm_to_vmem [thread:$0]  %s15_s11, 256, %s17_s13, [#allocation3]  }
   0x4   :  { %135 = dma.done.wait [#allocation3], 256  }
   0x5   :  { %136 = vsyncadd [#allocation3], 4294967040  ;;  %v26_v0 = vld [vmem:[#allocation2] sm:$0xff]  ;;  %v27_v1 = vld [vmem:[#allocation2 + $0x8] sm:$0xff]  ;;  %v140_v3 = vmov 0   ;;  %s141_s0 = smov [#allocation5]  }
   0x6   :  { %v28_v2 = vadd.f32 %v27_v1, %v26_v0  ;;  %82 = vset.pattern.permute.xlu0 %v140_v3  ;;  %v32_v4 = vld [vmem:[%s167_s1] sm:$0xff]  ;;  %s67_s1 = sshll.u32 %s141_s0, 4  ;;  %s69_s18 = sshll.u32 %s168_s2, 4  ;;  %s68_s1 = int_to_ptr.vmem [resolvable:$true] %s67_s1  ;;  %s70_s18 = int_to_ptr.hbm [resolvable:$true] %s69_s18 }
   0x8   :  { %29 = vadd.xlane.f32.xlu0 %v28_v2 }
  0x7b   :  { %v30_v5 = vpop.xlane.xlu0 %29 }
  0x7c   :  { %v31_v6 = vmul.f32 0.00390625, %v30_v5 }
  0x7e   :  { %v33_v7 = vmul.f32 %v32_v4, %v31_v6 }
  0x80   :  { %v34_v8 = vsub.f32 0.0, %v33_v7 }
  0x82   :  { %v35_v9 = vmul.f32 1.442695, %v34_v8 }
  0x84   :  { %83 = vpow2.f32 %v35_v9 }
  0x8a   :  { %v84_v10 = vpop.eup %83 }
  0x8b   :  { %v37_v11 = vadd.f32 1.0, %v84_v10 }
  0x8d   :  { %85 = vrcp.f32 %v37_v11  ;;  %v49_v15 = vand.u32 2147483648, %v37_v11  ;;  %v47_v17 = vand.u32 2147483647, %v37_v11  ;;  %vm43_vm1 = vweird.f32 %v37_v11 }
  0x8f   :  { %v50_v19 = vor.u32 1.1754944e-38, %v49_v15  ;;  %vm48_vm3 = vcmp.eq.f32.partialorder %v47_v17, 8.507059e+37 }
  0x93   :  { %v86_v12 = vpop.eup %85 }
  0x94   :  { %v39_v13 = vmul.f32 %v86_v12, %v37_v11  ;;  %vm44_vm0 = vweird.f32 %v86_v12 }
  0x95   :  { %vm45_vm2 = vmor %vm43_vm1, %vm44_vm0 }
  0x96   :  { %v40_v14 = vsub.f32 1.0, %v39_v13 }
  0x98   :  { %v41_v16 = vmul.f32 %v86_v12, %v40_v14 }
  0x9a   :  { %v42_v18 = vadd.f32 %v86_v12, %v41_v16 }
  0x9c   :  { %v46_v20 = vsel %vm45_vm2, %v86_v12, %v42_v18 }
  0x9d   :  { %v51_v21 = vsel %vm48_vm3, %v50_v19, %v46_v20 }
  0x9e   :  { %55 = vperm.xlu0 %82, %v51_v21  }
 0x110   :  { %v56_v22 = vpop.permute.xlu0 %55 }
 0x111   :  { %v58_v23 = vmul.f32 %v56_v22, %v26_v0  ;;  %v59_v24 = vmul.f32 %v56_v22, %v27_v1 }
 0x113   :  { %60 = vst [vmem:[#allocation5] sm:$0xff] %v58_v23 }
 0x114   :  { %61 = vst [vmem:[#allocation5 + $0x8] sm:$0xff] %v59_v24 }
 0x115   :  { %72 = dma.vmem_to_hbm [thread:$0]  %s68_s1, 256, %s70_s18, [#allocation4]  }
 0x116   :  { %137 = dma.done.wait [#allocation4], 256  }
 0x117   :  { %138 = vsyncadd [#allocation4], 4294967040 }
 0x118   :  { %77 = vsyncpa [#allocation3], 1 }
 0x119   :  { %78 = vsyncpa [#allocation4], 1 }

</bundles_post_ra>
